<compile_context>
chip_gen: v6e
topology: v6e:2x2x1
jax: 0.10.0
libtpu: 0.0.40
codegen_flags: <defaults>
</compile_context>

<pallas_src>
import jax
import jax.numpy as jnp
from jax.experimental import pallas as pl
from jax.experimental.pallas import tpu as pltpu


def _round_up(x: int, m: int) -> int:
    return ((x + m - 1) // m) * m


def _block_diag(m: jnp.ndarray, p: int) -> jnp.ndarray:
    """Replicate a [r, c] matrix p times along the diagonal -> [p*r, p*c]."""
    if p == 1:
        return m
    r, c = m.shape
    out = jnp.zeros((p * r, p * c), m.dtype)
    for q in range(p):
        out = out.at[q * r:(q + 1) * r, q * c:(q + 1) * c].set(m)
    return out


def pack_traj_encoding_params(w1, b1, w2, b2):
    """Call-once weight preprocessing (hoisted out of the per-forward path).

    w1: [d_in, d_out], b1: [d_out], w2: [d_out, d_out], b2: [d_out]
    (weights stored [in, out], i.e. transposed from nn.Linear's [out, in]).
    """
    d_in, d_out = w1.shape
    if d_out < 128 and 128 % d_out == 0:
        p = 128 // d_out
    else:
        p = 1                      # lane-sparse fallback; still correct
    dpi, dpo = p * d_in, p * d_out
    return dict(
        w1b=_block_diag(w1.astype(jnp.float32), p),           # [p*d_in,  p*d_out]
        w2b=_block_diag(w2.astype(jnp.float32), p),           # [p*d_out, p*d_out]
        b1b=jnp.tile(b1.astype(jnp.float32), p).reshape(1, dpo),
        b2b=jnp.tile(b2.astype(jnp.float32), p).reshape(1, dpo),
        p=p, d_in=d_in, d_out=d_out, dpi=dpi, dpo=dpo,
    )


def _traj_encoding_kernel(x_ref, w1_ref, b1_ref, w2_ref, b2_ref, o_ref):
    # fc1 + ReLU (packed feature axis; MXU slot has plenty of slack in this
    # memory-bound kernel, keeps VALU free for bias/ReLU/cast).
    h = jnp.dot(x_ref[...], w1_ref[...], preferred_element_type=jnp.float32)
    h = jnp.maximum(h + b1_ref[...], 0.0)
    # fc2 + Tanh (native lane-dense [TILE,128] @ [128,128] MXU matmul; tanh
    # goes to the EUP slot and overlaps with DMA/MXU).
    f = jnp.dot(h, w2_ref[...], preferred_element_type=jnp.float32)
    o_ref[...] = jnp.tanh(f + b2_ref[...]).astype(o_ref.dtype)


def traj_encoding_packed(trajs, params, *, max_tile_rows: int = 8192,
                         min_grid_steps: int = 4, out_dtype=jnp.float32):
    """trajs: [..., d_in] -> [..., d_out], using pre-packed params."""
    p, d_in, d_out = params["p"], params["d_in"], params["d_out"]
    dpi, dpo = params["dpi"], params["dpo"]

    *lead, din = trajs.shape
    assert din == d_in, f"expected last dim {d_in}, got {din}"
    n = 1
    for s in lead:
        n *= s
    n = max(n, 1)

    x2d = trajs.reshape(n, d_in).astype(jnp.float32)

    # Pad the row axis ONLY to a multiple of the pack factor (<= p-1 rows).
    n_pad = _round_up(n, p)
    if n_pad != n:
        x2d = jnp.pad(x2d, ((0, n_pad - n), (0, 0)))
    r_p = n_pad // p
    x_packed = x2d.reshape(r_p, dpi)          # zero-copy row-major reshape

    # Row tile: big enough to amortize the ~0.35 us/step grid overhead
    # (multi-MiB per step), capped by max_tile_rows (VMEM budget), and small
    # enough to leave >= min_grid_steps steps so both TCs get work on v7x.
    tile_r = _round_up(max(pl.cdiv(r_p, min_grid_steps), 1), 16)
    tile_r = max(16, min(tile_r, max_tile_rows))
    grid = (pl.cdiv(r_p, tile_r),)            # ragged last block -> masked

    in_bytes = jnp.dtype(jnp.float32).itemsize
    out_bytes = jnp.dtype(out_dtype).itemsize
    # Double-buffered input/output block footprint.  The narrow [tile_r, dpi]
    # input block is lane-padded to 128 in VMEM (up to 16x inflation).
    blk_bytes = (tile_r * max(dpi, 128) * in_bytes
                 + tile_r * _round_up(dpo, 128) * out_bytes)
    vmem_limit = min(48 * 1024 * 1024,
                     max(32 * 1024 * 1024, 2 * blk_bytes + 4 * 1024 * 1024))

    cost = pl.CostEstimate(
        flops=2 * r_p * (dpi * dpo + dpo * dpo),
        transcendentals=r_p * dpo,
        bytes_accessed=(in_bytes * (r_p * dpi + dpi * dpo + dpo * dpo + 2 * dpo)
                        + out_bytes * r_p * dpo),
    )

    out_packed = pl.pallas_call(
        _traj_encoding_kernel,
        out_shape=jax.ShapeDtypeStruct((r_p, dpo), out_dtype),
        grid_spec=pltpu.PrefetchScalarGridSpec(
            num_scalar_prefetch=0,
            grid=grid,
            in_specs=[
                pl.BlockSpec((tile_r, dpi), lambda i: (i, 0)),   # x (pipelined)
                pl.BlockSpec((dpi, dpo), lambda i: (0, 0)),      # w1 (resident)
                pl.BlockSpec((1, dpo), lambda i: (0, 0)),        # b1 (resident)
                pl.BlockSpec((dpo, dpo), lambda i: (0, 0)),      # w2 (resident)
                pl.BlockSpec((1, dpo), lambda i: (0, 0)),        # b2 (resident)
            ],
            out_specs=pl.BlockSpec((tile_r, dpo), lambda i: (i, 0)),
        ),
        compiler_params=pltpu.CompilerParams(
            dimension_semantics=("parallel",),   # rows independent; 2 TCs on v7x
            vmem_limit_bytes=vmem_limit,
        ),
        cost_estimate=cost,
    )(x_packed, params["w1b"], params["b1b"], params["w2b"], params["b2b"])

    out2d = out_packed.reshape(n_pad, d_out)   # zero-copy unpack
    if n_pad != n:
        out2d = out2d[:n]                      # tiny crop (only the p-pad)
    return out2d.reshape(*lead, d_out)


def traj_encoding(trajs, w1, b1, w2, b2, **kwargs):
    """Convenience wrapper: packs params then runs the kernel."""
    return traj_encoding_packed(trajs, pack_traj_encoding_params(w1, b1, w2, b2),
                                **kwargs)


def _ref_forward(trajs, w1, b1, w2, b2):
    h = jnp.maximum(trajs @ w1 + b1, 0.0)
    return jnp.tanh(h @ w2 + b2)


if __name__ == "__main__":
    input_units = 2
    output_units = 32
    batch, seq = 2, 8

    key = jax.random.PRNGKey(0)
    k_x, k_w1, k_b1, k_w2, k_b2, k_x2 = jax.random.split(key, 6)

    # Deterministic synthetic parameters (nn.Linear-equivalent, stored [in, out]).
    bound1 = 1.0 / (input_units ** 0.5)
    bound2 = 1.0 / (output_units ** 0.5)
    w1 = jax.random.uniform(k_w1, (input_units, output_units),
                            minval=-bound1, maxval=bound1, dtype=jnp.float32)
    b1 = jax.random.uniform(k_b1, (output_units,),
                            minval=-bound1, maxval=bound1, dtype=jnp.float32)
    w2 = jax.random.uniform(k_w2, (output_units, output_units),
                            minval=-bound2, maxval=bound2, dtype=jnp.float32)
    b2 = jax.random.uniform(k_b2, (output_units,),
                            minval=-bound2, maxval=bound2, dtype=jnp.float32)

    # Pack the weights once (hoisted preprocessing), reuse across calls.
    packed = pack_traj_encoding_params(w1, b1, w2, b2)

    # Case 1: small module-consistent shape (single ragged grid step).
    trajs = jax.random.normal(k_x, (batch, seq, input_units), dtype=jnp.float32)
    out = jax.block_until_ready(traj_encoding_packed(trajs, packed))
    ref = _ref_forward(trajs, w1, b1, w2, b2)
    assert out.shape == (batch, seq, output_units)
    assert jnp.allclose(out, ref, atol=1e-5, rtol=1e-5)

    # Case 2: multi-step grid with a ragged last block, row count not a
    # multiple of the pack factor (crop path), resident-weight reuse.
    trajs2 = jax.random.normal(k_x2, (3, 1001, input_units), dtype=jnp.float32)
    out2 = jax.block_until_ready(
        traj_encoding_packed(trajs2, packed, max_tile_rows=64))
    ref2 = _ref_forward(trajs2, w1, b1, w2, b2)
    assert out2.shape == (3, 1001, output_units)
    assert jnp.allclose(out2, ref2, atol=1e-4, rtol=1e-4)

    print("KERNEL_OK")
</pallas_src>

<mosaic_0001>
module attributes {stable_mosaic.version = 11 : i64} {
  func.func @_traj_encoding_kernel(%arg0: i32, %arg1: memref<16x8xf32, #tpu.memory_space<vmem>>, %arg2: memref<8x128xf32, #tpu.memory_space<vmem>>, %arg3: memref<1x128xf32, #tpu.memory_space<vmem>>, %arg4: memref<128x128xf32, #tpu.memory_space<vmem>>, %arg5: memref<1x128xf32, #tpu.memory_space<vmem>>, %arg6: memref<16x128xf32, #tpu.memory_space<vmem>>) attributes {dimension_semantics = [#tpu.dimension_semantics<parallel>], iteration_bounds = array<i64: 1>, scalar_prefetch = 0 : i64, scratch_operands = 0 : i64, tpu.core_type = #tpu.core_type<tc>, window_params = [{transform_indices = @transform_0, window_bounds = array<i64: 16, 8>}, {pipeline_mode = #tpu.pipeline_mode<synchronous>, transform_indices = @transform_1, window_bounds = array<i64: 8, 128>}, {pipeline_mode = #tpu.pipeline_mode<synchronous>, transform_indices = @transform_2, window_bounds = array<i64: 1, 128>}, {pipeline_mode = #tpu.pipeline_mode<synchronous>, transform_indices = @transform_3, window_bounds = array<i64: 128, 128>}, {pipeline_mode = #tpu.pipeline_mode<synchronous>, transform_indices = @transform_4, window_bounds = array<i64: 1, 128>}, {transform_indices = @transform_5, window_bounds = array<i64: 16, 128>}]} {
    %c0 = arith.constant 0 : index
    %c0_0 = arith.constant 0 : index
    %0 = vector.load %arg1[%c0, %c0_0] : memref<16x8xf32, #tpu.memory_space<vmem>>, vector<16x8xf32>
    %c0_1 = arith.constant 0 : index
    %c0_2 = arith.constant 0 : index
    %1 = vector.load %arg2[%c0_1, %c0_2] : memref<8x128xf32, #tpu.memory_space<vmem>>, vector<8x128xf32>
    %cst = arith.constant dense<0.000000e+00> : vector<16x128xf32>
    %2 = tpu.matmul %0, %1, %cst {dimension_numbers = #tpu.dot_dimension_numbers<[1], [0], [0], [1], [0, 0, 1, 1], [], []>} : vector<16x8xf32>, vector<8x128xf32>, vector<16x128xf32> -> vector<16x128xf32>
    %c0_3 = arith.constant 0 : index
    %c0_4 = arith.constant 0 : index
    %3 = vector.load %arg3[%c0_3, %c0_4] : memref<1x128xf32, #tpu.memory_space<vmem>>, vector<1x128xf32>
    %4 = vector.broadcast %3 : vector<1x128xf32> to vector<16x128xf32>
    %5 = arith.addf %2, %4 : vector<16x128xf32>
    %cst_5 = arith.constant 0.000000e+00 : f32
    %6 = vector.broadcast %cst_5 : f32 to vector<16x128xf32>
    %7 = arith.maximumf %5, %6 : vector<16x128xf32>
    %c0_6 = arith.constant 0 : index
    %c0_7 = arith.constant 0 : index
    %8 = vector.load %arg4[%c0_6, %c0_7] : memref<128x128xf32, #tpu.memory_space<vmem>>, vector<128x128xf32>
    %cst_8 = arith.constant dense<0.000000e+00> : vector<16x128xf32>
    %9 = tpu.matmul %7, %8, %cst_8 {dimension_numbers = #tpu.dot_dimension_numbers<[1], [0], [0], [1], [0, 0, 1, 1], [], []>} : vector<16x128xf32>, vector<128x128xf32>, vector<16x128xf32> -> vector<16x128xf32>
    %c0_9 = arith.constant 0 : index
    %c0_10 = arith.constant 0 : index
    %10 = vector.load %arg5[%c0_9, %c0_10] : memref<1x128xf32, #tpu.memory_space<vmem>>, vector<1x128xf32>
    %11 = vector.broadcast %10 : vector<1x128xf32> to vector<16x128xf32>
    %12 = arith.addf %9, %11 : vector<16x128xf32>
    %13 = math.tanh %12 : vector<16x128xf32>
    %c0_11 = arith.constant 0 : index
    %c0_12 = arith.constant 0 : index
    %14 = vector.load %arg6[%c0_11, %c0_12] : memref<16x128xf32, #tpu.memory_space<vmem>>, vector<16x128xf32>
    tpu.vector_store %arg6[%c0_11, %c0_12], %13 {strides = array<i32>} : memref<16x128xf32, #tpu.memory_space<vmem>>, vector<16x128xf32>,
    return
  }
  func.func @transform_0(%arg0: i32) -> (i32, i32) {
    %c0_i32 = arith.constant 0 : i32
    %c0_i32_0 = arith.constant 0 : i32
    return %arg0, %c0_i32 : i32, i32
  }
  func.func @transform_1(%arg0: i32) -> (i32, i32) {
    %c0_i32 = arith.constant 0 : i32
    %c0_i32_0 = arith.constant 0 : i32
    %c0_i32_1 = arith.constant 0 : i32
    return %c0_i32, %c0_i32_0 : i32, i32
  }
  func.func @transform_2(%arg0: i32) -> (i32, i32) {
    %c0_i32 = arith.constant 0 : i32
    %c0_i32_0 = arith.constant 0 : i32
    %c0_i32_1 = arith.constant 0 : i32
    return %c0_i32, %c0_i32_0 : i32, i32
  }
  func.func @transform_3(%arg0: i32) -> (i32, i32) {
    %c0_i32 = arith.constant 0 : i32
    %c0_i32_0 = arith.constant 0 : i32
    %c0_i32_1 = arith.constant 0 : i32
    return %c0_i32, %c0_i32_0 : i32, i32
  }
  func.func @transform_4(%arg0: i32) -> (i32, i32) {
    %c0_i32 = arith.constant 0 : i32
    %c0_i32_0 = arith.constant 0 : i32
    %c0_i32_1 = arith.constant 0 : i32
    return %c0_i32, %c0_i32_0 : i32, i32
  }
  func.func @transform_5(%arg0: i32) -> (i32, i32) {
    %c0_i32 = arith.constant 0 : i32
    %c0_i32_0 = arith.constant 0 : i32
    return %arg0, %c0_i32 : i32, i32
  }
}

</mosaic_0001>

<bundles_post_ra>
// kernel: tpu_custom_call.1
= control target key start
LH: loop header
LB: loop body
LE: loop exit
PB: predicated region body
PF: predicated region fallthrough
CT: control target
= control target key end

     0   :  { %10 = vsyncpa [#allocation3], 0  ;;  %s499_s0 = inlined_call_operand.hbm [shape: f32[4,8], index: 0, kind: input, shape index: {}]   ;;  %s500_s1 = inlined_call_operand.hbm [shape: f32[8,128], index: 1, kind: input, shape index: {}]   ;;  %s501_s2 = inlined_call_operand.vmem [shape: f32[1,128], index: 2, kind: input, shape index: {}]   ;;  %s502_s3 = inlined_call_operand.hbm [shape: f32[128,128], index: 3, kind: input, shape index: {}]   ;;  %s503_s4 = inlined_call_operand.vmem [shape: f32[1,128], index: 4, kind: input, shape index: {}]   ;;  %s504_s5 = inlined_call_operand.hbm [shape: f32[4,128], index: 5, kind: output, shape index: {}]  }
   0x1   :  { %11 = vsyncpa [#allocation6], 0 }
   0x2   :  { %12 = vsyncpa [#allocation4], 0 }
   0x3   :  { %17 = vsyncadd [#allocation3], 192  ;;  %s437_s18 = smov [#allocation5]   ;;  %s438_s20 = smov [#allocation2]  }
   0x4   :  { %s31_s19 = sshll.u32 %s437_s18, 4  ;;  %s18_s21 = sshll.u32 %s438_s20, 4  ;;  %s32_s19 = int_to_ptr.vmem [resolvable:$true] %s31_s19  ;;  %s19_s21 = int_to_ptr.vmem [resolvable:$true] %s18_s21 }
   0x5   :  { %s359_s22 = scalar_lea.vmem %s32_s19, 128  ;;  %p364_p1 = scmp.lt.s32.totalorder %s32_s19, %s32_s19 }
   0x6   :  { %p360_p0 = scmp.ne.s32.totalorder %s32_s19, %s359_s22  ;;  %p365_p2 = scmp.lt.s32.totalorder %s359_s22, %s359_s22 }
   0x8   :  { %p366_p3 = por %p365_p2, %p364_p1 }
   0xa   :  { %p367_p4 = pnand %p366_p3, %p360_p0 }
   0xc   :  { %370 = shalt.err (!%p367_p4)
}
   0xd   :  { %34 = dma.hbm_to_vmem [thread:$0]  %s500_s1, 128, %s32_s19, [#allocation6]  }
   0xe   :  { %s379_s25 = scalar_lea.vmem %s19_s21, 64  ;;  %s383_s26 = scalar_lea.vmem %s19_s21, 256 }
   0xf   :  { %p380_p5 = scmp.ne.s32.totalorder %s19_s21, %s379_s25  ;;  %p384_p6 = scmp.lt.s32.totalorder %s19_s21, %s19_s21 }
  0x10   :  { %p385_p7 = scmp.lt.s32.totalorder %s383_s26, %s379_s25 }
  0x12   :  { %p386_p8 = por %p385_p7, %p384_p6 }
  0x14   :  { %p387_p9 = pnand %p386_p8, %p380_p5 }
  0x16   :  { %390 = shalt.err (!%p387_p9)
}
  0x17   :  { %s439_s27 = smov 64   ;;  %s440_s28 = smov 4  }
  0x18   :  { %24 = dma.hbm_to_vmem [thread:$0]  %s499_s0, 64, %s19_s21, [#allocation3], %s439_s27, %s439_s27, %s440_s28  }
  0x19   :  { %s441_s6 = smov [#allocation7]  }
  0x1a   :  { %s42_s7 = sshll.u32 %s441_s6, 4  ;;  %s43_s7 = int_to_ptr.vmem [resolvable:$true] %s42_s7 }
  0x1b   :  { %s399_s1 = scalar_lea.vmem %s43_s7, 2048  ;;  %p404_p11 = scmp.lt.s32.totalorder %s43_s7, %s43_s7 }
  0x1c   :  { %p400_p10 = scmp.ne.s32.totalorder %s43_s7, %s399_s1  ;;  %p405_p12 = scmp.lt.s32.totalorder %s399_s1, %s399_s1 }
  0x1e   :  { %p406_p13 = por %p405_p12, %p404_p11 }
  0x20   :  { %p407_p0 = pnand %p406_p13, %p400_p10 }
  0x22   :  { %410 = shalt.err (!%p407_p0)
}
  0x23   :  { %s442_s8 = smov 128   ;;  %s443_s9 = smov 8  }
  0x24   :  { %48 = dma.hbm_to_vmem [thread:$0]  %s502_s3, 2048, %s43_s7, [#allocation6], %s442_s8, %s442_s8, %s443_s9  }
  0x25   :  { %431 = dma.done.wait [#allocation3], 256  }
  0x26   :  { %432 = vsyncadd [#allocation3], 4294967040 }
  0x27   :  { %433 = dma.done.wait [#allocation6], 2176  }
  0x28   :  { %434 = vsyncadd [#allocation6], 4294965120  ;;  %vm70_vm0 = vcmask 64512   ;;  %v62_v0 = vld [vmem:[#allocation5] sm:$0xff]  ;;  %v60_v1 = vld [vmem:[#allocation2] sm:$0xff] }
  0x29   :  { %v61_v2 = vld [vmem:[#allocation2 + $0x8] sm:$0xff]  ;;  %299 = vmatprep.subr.mxu0 %v62_v0  ;;  %301 = vmatprep.mubr.msk.f32.mxu0 %vm70_vm0, %v60_v1  ;;  %v169_v3 = vld [vmem:[#allocation7 + $0x78] sm:$0xff]  ;;  %v167_v5 = vld [vmem:[#allocation7 + $0x68] sm:$0xff] }
  0x2a   :  { %v168_v4 = vld [vmem:[#allocation7 + $0x70] sm:$0xff]  ;;  %300 = vmatpush3.msra.mxu0 %v62_v0  ;;  %304 = vmatprep.subr.mxu1 %v169_v3  ;;  %v166_v6 = vld [vmem:[#allocation7 + $0x60] sm:$0xff]  ;;  %v165_v7 = vld [vmem:[#allocation7 + $0x58] sm:$0xff] }
  0x2b   :  { %302 = vmatmul.mubr.msk.f32.vlgmr.msra.gmra.mxu0 %vm70_vm0, %v61_v2  ;;  %305 = vmatpush3.msra.mxu1 %v169_v3  ;;  %v164_v8 = vld [vmem:[#allocation7 + $0x50] sm:$0xff]  ;;  %v163_v9 = vld [vmem:[#allocation7 + $0x48] sm:$0xff]  ;;  %v162_v10 = vld [vmem:[#allocation7 + $0x40] sm:$0xff] }
  0x2c   :  { %306 = vmatprep.subr.mxu1 %v168_v4  ;;  %v161_v11 = vld [vmem:[#allocation7 + $0x38] sm:$0xff]  ;;  %v160_v12 = vld [vmem:[#allocation7 + $0x30] sm:$0xff]  ;;  %v159_v13 = vld [vmem:[#allocation7 + $0x28] sm:$0xff] }
  0x2d   :  { %307 = vmatpush3.msra.mxu1 %v168_v4  ;;  %v158_v14 = vld [vmem:[#allocation7 + $0x20] sm:$0xff]  ;;  %v157_v15 = vld [vmem:[#allocation7 + $0x18] sm:$0xff]  ;;  %v156_v16 = vld [vmem:[#allocation7 + $0x10] sm:$0xff] }
  0x2e   :  { %308 = vmatprep.subr.mxu1 %v167_v5  ;;  %v155_v17 = vld [vmem:[#allocation7 + $0x8] sm:$0xff]  ;;  %v154_v18 = vld [vmem:[#allocation7] sm:$0xff] }
  0x2f   :  { %309 = vmatpush3.msra.mxu1 %v167_v5  ;;  %v274_v19 = vld [vmem:[%s501_s2] ss:$0 sm:$0xff] }
  0x30   :  { %310 = vmatprep.subr.mxu1 %v166_v6  ;;  %v277_v26 = vld [vmem:[%s503_s4] ss:$0 sm:$0xff] }
  0x31   :  { %311 = vmatpush3.msra.mxu1 %v166_v6 }
  0x32   :  { %312 = vmatprep.subr.mxu1 %v165_v7 }
  0x33   :  { %313 = vmatpush3.msra.mxu1 %v165_v7 }
  0x34   :  { %314 = vmatprep.subr.mxu1 %v164_v8 }
  0x35   :  { %315 = vmatpush3.msra.mxu1 %v164_v8 }
  0x36   :  { %316 = vmatprep.subr.mxu1 %v163_v9 }
  0x37   :  { %317 = vmatpush3.msra.mxu1 %v163_v9 }
  0x38   :  { %318 = vmatprep.subr.mxu1 %v162_v10 }
  0x39   :  { %319 = vmatpush3.msra.mxu1 %v162_v10 }
  0x3a   :  { %320 = vmatprep.subr.mxu1 %v161_v11 }
  0x3b   :  { %321 = vmatpush3.msra.mxu1 %v161_v11 }
  0x3c   :  { %322 = vmatprep.subr.mxu1 %v160_v12 }
  0x3d   :  { %323 = vmatpush3.msra.mxu1 %v160_v12 }
  0x3e   :  { %324 = vmatprep.subr.mxu1 %v159_v13 }
  0x3f   :  { %325 = vmatpush3.msra.mxu1 %v159_v13 }
  0x40   :  { %326 = vmatprep.subr.mxu1 %v158_v14 }
  0x41   :  { %327 = vmatpush3.msra.mxu1 %v158_v14 }
  0x42   :  { %328 = vmatprep.subr.mxu1 %v157_v15 }
  0x43   :  { %329 = vmatpush3.msra.mxu1 %v157_v15 }
  0x44   :  { %330 = vmatprep.subr.mxu1 %v156_v16 }
  0x45   :  { %331 = vmatpush3.msra.mxu1 %v156_v16 }
  0x46   :  { %332 = vmatprep.subr.mxu1 %v155_v17 }
  0x47   :  { %333 = vmatpush3.msra.mxu1 %v155_v17 }
  0x48   :  { %334 = vmatprep.subr.mxu1 %v154_v18 }
  0x49   :  { %335 = vmatpush3.msra.mxu1 %v154_v18 }
  0xeb   :  { %v303_v20 = vpop.f32.mrf.mxu0 }
  0xec   :  { %v149_v21 = vadd.f32 %v303_v20, %v274_v19 }
  0xed   :  { %v143_v22 = vpop.f32.mrf.mxu0 }
  0xee   :  { %v144_v23 = vadd.f32 %v274_v19, %v143_v22  ;;  %v153_v25 = vmax.f32 %v149_v21, 0.0 }
  0xf0   :  { %v152_v24 = vmax.f32 %v144_v23, 0.0 }
  0xf2   :  { %336 = vmatprep.mubr.f32.mxu1 %v152_v24 }
  0xf3   :  { %337 = vmatmul.mubr.f32.vlgmr.msra.gmra.mxu1 %v153_v25 }
 0x1b3   :  { %v338_v27 = vpop.f32.mrf.mxu1 }
 0x1b4   :  { %v249_v28 = vadd.f32 %v338_v27, %v277_v26 }
 0x1b5   :  { %v243_v29 = vpop.f32.mrf.mxu1 }
 0x1b6   :  { %347 = vtanh.f32 %v249_v28  ;;  %v244_v30 = vadd.f32 %v277_v26, %v243_v29 }
 0x1b8   :  { %349 = vtanh.f32 %v244_v30 }
 0x1c3   :  { %v348_v31 = vpop.eup %347 }
 0x1c4   :  { %255 = vst [vmem:[#allocation8 + $0x8] sm:$0xff] %v348_v31 }
 0x1c5   :  { %v350_v32 = vpop.eup %349 }
 0x1c6   :  { %254 = vst [vmem:[#allocation8] sm:$0xff] %v350_v32 }
 0x1c7   :  { %260 = vsyncadd [#allocation4], 192  ;;  %s444_s2 = smov [#allocation8]  }
 0x1c8   :  { %s261_s14 = sshll.u32 %s444_s2, 4  ;;  %s262_s14 = int_to_ptr.vmem [resolvable:$true] %s261_s14 }
 0x1c9   :  { %s411_s15 = scalar_lea.vmem %s262_s14, 64  ;;  %s415_s16 = scalar_lea.vmem %s262_s14, 256 }
 0x1ca   :  { %p412_p1 = scmp.ne.s32.totalorder %s262_s14, %s411_s15  ;;  %p416_p2 = scmp.lt.s32.totalorder %s262_s14, %s262_s14 }
 0x1cb   :  { %p417_p3 = scmp.lt.s32.totalorder %s415_s16, %s411_s15 }
 0x1cd   :  { %p418_p4 = por %p417_p3, %p416_p2 }
 0x1cf   :  { %p419_p5 = pnand %p418_p4, %p412_p1 }
 0x1d1   :  { %422 = shalt.err (!%p419_p5)
}
 0x1d2   :  { %267 = dma.vmem_to_hbm [thread:$0]  %s262_s14, 64, %s504_s5, [#allocation4], %s439_s27, %s439_s27, %s440_s28  }
 0x1d3   :  { %435 = dma.done.wait [#allocation4], 256  }
 0x1d4   :  { %436 = vsyncadd [#allocation4], 4294967040 }
 0x1d5   :  { %271 = vsyncpa [#allocation3], 1 }
 0x1d6   :  { %272 = vsyncpa [#allocation6], 1 }
 0x1d7   :  { %273 = vsyncpa [#allocation4], 1 }

</bundles_post_ra>
